<compile_context>
chip_gen: v7x
topology: tpu7x:2x2x1
jax: 0.10.0
libtpu: 0.0.40
codegen_flags: <defaults>
</compile_context>

<pallas_src>
import jax
import jax.numpy as jnp
from jax import lax
from jax.experimental import pallas as pl
from jax.experimental.pallas import tpu as pltpu


def _round_up(n, m):
    return ((n + m - 1) // m) * m


def value_net_kernel(x_ref, w1_ref, b1_ref, w2_ref, b2_ref, o_ref):
    # Layer 1 on the MXU (bf16 or f32 inputs, f32 accumulation), f32 epilogue.
    h = jnp.dot(x_ref[...], w1_ref[...], preferred_element_type=jnp.float32)
    h = jnp.maximum(h + b1_ref[...], 0.0)                       # (tb, H) f32, VPU
    # Layer 2 (N == 1): contract the hidden axis of h against the single W2 row
    # -> lane-dense (1, tb) result (batch along lanes). b2 is an SMEM scalar.
    v = lax.dot_general(w2_ref[...], h, (((1,), (1,)), ((), ())),
                        preferred_element_type=jnp.float32) + b2_ref[0]
    o_ref[...] = v.astype(o_ref.dtype)                          # unmasked lane-dense store


def value_net_forward(x, w1, b1, w2_row, b2, *, block_b=8192, core_parallel=False):
    """ValueNet forward: relu(x @ W1 + b1) @ W2 + b2.

    x      : (B, K)  activations, feature axis last (f32 or bf16)
    w1     : (K, H)  first-layer weight, transposed vs. PyTorch (f32 or bf16)
    b1     : (1, H)  first-layer bias (f32)
    w2_row : (1, H)  second-layer weight as a row (PyTorch weight is (1, H), f32)
    b2     : (1,)    second-layer bias (scalar, lives in SMEM)
    returns (B, 1) float32
    """
    B, K = x.shape
    H = w1.shape[1]

    # Batch tile with NO wrapper-side padding of x:
    #  * B <= block_b : one full-extent block (legal for any B, even B % 8 != 0).
    #  * B  > block_b : a 32-aligned tile (sublane-safe for f32/bf16/i8); a
    #    ragged trailing block is masked by Pallas, and its few junk output
    #    lanes are sliced off below (<= B*4 bytes, negligible vs. streaming x).
    if B <= block_b:
        tb = B
    else:
        tb = _round_up(pl.cdiv(B, pl.cdiv(B, block_b)), 32)
    grid_b = pl.cdiv(B, tb)

    flops = 2 * B * K * H + 2 * B * H + 3 * B * H         # l1 matmul + l2 + bias/relu
    bytes_accessed = (B * K * x.dtype.itemsize + K * H * w1.dtype.itemsize
                      + 3 * H * 4 + 4 + B * 4)

    out = pl.pallas_call(
        value_net_kernel,
        out_shape=jax.ShapeDtypeStruct((grid_b, tb), jnp.float32),
        grid=(grid_b,),
        in_specs=[
            pl.BlockSpec((tb, K), lambda i: (i, 0)),            # x: streamed over batch
            pl.BlockSpec((K, H), lambda i: (0, 0)),             # W1: resident in VMEM
            pl.BlockSpec((1, H), lambda i: (0, 0)),             # b1: resident
            pl.BlockSpec((1, H), lambda i: (0, 0)),             # W2 row: resident
            pl.BlockSpec(memory_space=pltpu.MemorySpace.SMEM),  # b2 scalar in SMEM
        ],
        out_specs=pl.BlockSpec((1, tb), lambda i: (i, 0)),      # lane-dense output row
        compiler_params=pltpu.CompilerParams(
            # TODO(synk): flip core_parallel=True on v7x (2 TCs/chip) once
            # verified on hardware; plain PARALLEL is safe on v5e/v6e (1 TC).
            dimension_semantics=(
                pltpu.CORE_PARALLEL if core_parallel else pltpu.PARALLEL,),
            vmem_limit_bytes=48 << 20,
        ),
        cost_estimate=pl.CostEstimate(
            flops=flops, transcendentals=0, bytes_accessed=bytes_accessed),
    )(x, w1, b1, w2_row, b2)

    # (grid_b, tb) row-major is exactly the flat batch; drop any trailing
    # partial-block junk and restore the module's (B, 1) output shape.
    return out.reshape(grid_b * tb)[:B].reshape(B, 1)


def init_params(key, action_size, hidden_dim, dtype=jnp.float32):
    """Deterministic init matching nn.Linear default (uniform +/- 1/sqrt(fan_in))."""
    k1, k2, k3, k4 = jax.random.split(key, 4)
    bound1 = 1.0 / (action_size ** 0.5)
    bound2 = 1.0 / (hidden_dim ** 0.5)
    w1 = jax.random.uniform(k1, (action_size, hidden_dim), dtype, -bound1, bound1)
    b1 = jax.random.uniform(k2, (1, hidden_dim), dtype, -bound1, bound1)
    w2_row = jax.random.uniform(k3, (1, hidden_dim), dtype, -bound2, bound2)
    b2 = jax.random.uniform(k4, (1,), dtype, -bound2, bound2)
    return w1, b1, w2_row, b2


if __name__ == "__main__":
    # action_size comes from data['word'].x.size()[0]; use a small synthetic value.
    batch = 2
    action_size = 16
    hidden_dim = 128  # ValueNet default hidden_dim

    key = jax.random.PRNGKey(0)
    kx, kp = jax.random.split(key)

    # Per the perf review: activations + layer-1 weight in bf16 (MXU-native on
    # v5e/v6e/v7x, halves x's HBM read traffic). Epilogue params stay f32.
    x = jax.random.normal(kx, (batch, action_size), jnp.bfloat16)
    w1, b1, w2_row, b2 = init_params(kp, action_size, hidden_dim)
    w1 = w1.astype(jnp.bfloat16)

    out = jax.block_until_ready(value_net_forward(x, w1, b1, w2_row, b2))

    # Pure-JAX reference: f32 math on the same bf16-valued inputs.
    x32, w1_32 = x.astype(jnp.float32), w1.astype(jnp.float32)
    ref = jnp.maximum(x32 @ w1_32 + b1, 0.0) @ w2_row.T + b2[0]

    assert out.shape == (batch, 1)
    # bf16 layer-1 inputs + default-precision layer-2 matmul need a looser
    # tolerance than the old all-f32 path (flagged in the perf review).
    assert jnp.allclose(out, ref.astype(jnp.float32), atol=5e-2, rtol=5e-2)

    print("KERNEL_OK")
</pallas_src>

<mosaic_0001>
module attributes {stable_mosaic.version = 11 : i64} {
  func.func @value_net_kernel(%arg0: i32, %arg1: memref<2x16xbf16, #tpu.memory_space<vmem>>, %arg2: memref<16x128xbf16, #tpu.memory_space<vmem>>, %arg3: memref<1x128xf32, #tpu.memory_space<vmem>>, %arg4: memref<1x128xf32, #tpu.memory_space<vmem>>, %arg5: memref<1xf32, #tpu.memory_space<smem>>, %arg6: memref<1x2xf32, #tpu.memory_space<vmem>>) attributes {dimension_semantics = [#tpu.dimension_semantics<parallel>], iteration_bounds = array<i64: 1>, scalar_prefetch = 0 : i64, scratch_operands = 0 : i64, tpu.core_type = #tpu.core_type<tc>, window_params = [{transform_indices = @transform_0, window_bounds = array<i64: 2, 16>}, {pipeline_mode = #tpu.pipeline_mode<synchronous>, transform_indices = @transform_1, window_bounds = array<i64: 16, 128>}, {pipeline_mode = #tpu.pipeline_mode<synchronous>, transform_indices = @transform_2, window_bounds = array<i64: 1, 128>}, {pipeline_mode = #tpu.pipeline_mode<synchronous>, transform_indices = @transform_3, window_bounds = array<i64: 1, 128>}, {transform_indices = @transform_4, window_bounds = array<i64: 1>}, {transform_indices = @transform_5, window_bounds = array<i64: 1, 2>}]} {
    %c0 = arith.constant 0 : index
    %c0_0 = arith.constant 0 : index
    %0 = vector.load %arg1[%c0, %c0_0] : memref<2x16xbf16, #tpu.memory_space<vmem>>, vector<2x16xbf16>
    %c0_1 = arith.constant 0 : index
    %c0_2 = arith.constant 0 : index
    %1 = vector.load %arg2[%c0_1, %c0_2] : memref<16x128xbf16, #tpu.memory_space<vmem>>, vector<16x128xbf16>
    %cst = arith.constant dense<0.000000e+00> : vector<2x128xf32>
    %2 = tpu.matmul %0, %1, %cst {dimension_numbers = #tpu.dot_dimension_numbers<[1], [0], [0], [1], [0, 0, 1, 1], [], []>} : vector<2x16xbf16>, vector<16x128xbf16>, vector<2x128xf32> -> vector<2x128xf32>
    %c0_3 = arith.constant 0 : index
    %c0_4 = arith.constant 0 : index
    %3 = vector.load %arg3[%c0_3, %c0_4] : memref<1x128xf32, #tpu.memory_space<vmem>>, vector<1x128xf32>
    %4 = vector.broadcast %3 : vector<1x128xf32> to vector<2x128xf32>
    %5 = arith.addf %2, %4 : vector<2x128xf32>
    %cst_5 = arith.constant 0.000000e+00 : f32
    %6 = vector.broadcast %cst_5 : f32 to vector<2x128xf32>
    %7 = arith.maximumf %5, %6 : vector<2x128xf32>
    %c0_6 = arith.constant 0 : index
    %c0_7 = arith.constant 0 : index
    %8 = vector.load %arg4[%c0_6, %c0_7] : memref<1x128xf32, #tpu.memory_space<vmem>>, vector<1x128xf32>
    %cst_8 = arith.constant dense<0.000000e+00> : vector<1x2xf32>
    %9 = tpu.matmul %8, %7, %cst_8 {dimension_numbers = #tpu.dot_dimension_numbers<[1], [1], [0], [0], [0, 0, 1, 0], [], []>} : vector<1x128xf32>, vector<2x128xf32>, vector<1x2xf32> -> vector<1x2xf32>
    %c0_9 = arith.constant 0 : index
    %10 = memref.load %arg5[%c0_9] : memref<1xf32, #tpu.memory_space<smem>>
    %11 = vector.broadcast %10 : f32 to vector<1x2xf32>
    %12 = arith.addf %9, %11 : vector<1x2xf32>
    %c0_10 = arith.constant 0 : index
    %c0_11 = arith.constant 0 : index
    %13 = vector.load %arg6[%c0_10, %c0_11] : memref<1x2xf32, #tpu.memory_space<vmem>>, vector<1x2xf32>
    tpu.vector_store %arg6[%c0_10, %c0_11], %12 {strides = array<i32>} : memref<1x2xf32, #tpu.memory_space<vmem>>, vector<1x2xf32>,
    return
  }
  func.func @transform_0(%arg0: i32) -> (i32, i32) {
    %c0_i32 = arith.constant 0 : i32
    %c0_i32_0 = arith.constant 0 : i32
    return %arg0, %c0_i32 : i32, i32
  }
  func.func @transform_1(%arg0: i32) -> (i32, i32) {
    %c0_i32 = arith.constant 0 : i32
    %c0_i32_0 = arith.constant 0 : i32
    %c0_i32_1 = arith.constant 0 : i32
    return %c0_i32, %c0_i32_0 : i32, i32
  }
  func.func @transform_2(%arg0: i32) -> (i32, i32) {
    %c0_i32 = arith.constant 0 : i32
    %c0_i32_0 = arith.constant 0 : i32
    %c0_i32_1 = arith.constant 0 : i32
    return %c0_i32, %c0_i32_0 : i32, i32
  }
  func.func @transform_3(%arg0: i32) -> (i32, i32) {
    %c0_i32 = arith.constant 0 : i32
    %c0_i32_0 = arith.constant 0 : i32
    %c0_i32_1 = arith.constant 0 : i32
    return %c0_i32, %c0_i32_0 : i32, i32
  }
  func.func @transform_4(%arg0: i32) -> i32 {
    %c0_i32 = arith.constant 0 : i32
    %c0_i32_0 = arith.constant 0 : i32
    return %c0_i32 : i32
  }
  func.func @transform_5(%arg0: i32) -> (i32, i32) {
    %c0_i32 = arith.constant 0 : i32
    %c0_i32_0 = arith.constant 0 : i32
    return %arg0, %c0_i32 : i32, i32
  }
}

</mosaic_0001>

<bundles_post_ra>
// kernel: tpu_custom_call.1
= control target key start
LH: loop header
LB: loop body
LE: loop exit
PB: predicated region body
PF: predicated region fallthrough
CT: control target
= control target key end

     0   :  { %11 = vsyncpa [#allocation4], 0  ;;  %s333_s0 = inlined_call_operand.vmem [shape: bf16[2,16], index: 0, kind: input, shape index: {}]   ;;  %s334_s1 = inlined_call_operand.hbm [shape: bf16[16,128], index: 1, kind: input, shape index: {}]   ;;  %s335_s2 = inlined_call_operand.vmem [shape: f32[1,128], index: 2, kind: input, shape index: {}]   ;;  %s336_s3 = inlined_call_operand.vmem [shape: f32[1,128], index: 3, kind: input, shape index: {}]   ;;  %s337_s4 = inlined_call_operand.<no memory space> [shape: f32[1], index: 4, kind: input, shape index: {}]   ;;  %s338_s5 = inlined_call_operand.hbm [shape: f32[1,2], index: 5, kind: output, shape index: {}]  }
   0x1   :  { %12 = vsyncpa [#allocation5], 0  ;;  %s261_s18 = smov [#allocation3]   ;;  %s213_s22 = scalar_lea.hbm %s334_s1, 128 }
   0x2   :  { %s20_s19 = sshll.u32 %s261_s18, 4  ;;  %p214_p0 = scmp.ne.s32.totalorder %s334_s1, %s213_s22  ;;  %s21_s19 = int_to_ptr.vmem [resolvable:$true] %s20_s19 }
   0x3   :  { %p217_p1 = scmp.lt.u32.totalorder %s213_s22, %s334_s1 }
   0x5   :  { %p219_p2 = pnand %p217_p1, %p214_p0 }
   0x7   :  { %222 = shalt.err (!%p219_p2)
}
   0x8   :  { %s223_s27 = scalar_lea.vmem %s21_s19, 128  ;;  %p228_p4 = scmp.lt.s32.totalorder %s21_s19, %s21_s19 }
   0x9   :  { %p224_p3 = scmp.ne.s32.totalorder %s21_s19, %s223_s27  ;;  %p229_p5 = scmp.lt.s32.totalorder %s223_s27, %s223_s27 }
   0xb   :  { %p230_p6 = por %p229_p5, %p228_p4 }
   0xd   :  { %p231_p7 = pnand %p230_p6, %p224_p3 }
   0xf   :  { %234 = shalt.err (!%p231_p7)
}
  0x10   :  { %s262_s28 = smov 64   ;;  %s263_s29 = smov 4  }
  0x11   :  { %26 = dma.hbm_to_vmem [thread:$0]  %s334_s1, 128, %s21_s19, [#allocation4], %s262_s28, %s262_s28, %s263_s29  }
  0x12   :  { %257 = dma.done.wait [#allocation4], 128  }
  0x13   :  { %258 = vsyncadd [#allocation4], 4294967168  ;;  %v264_v0 = vmov 0.0   ;;  %vm265_vm0 = vmmov 0   ;;  %v212_v1 = vld [vmem:[#allocation3] sm:$0xff]   ;;  %vm53_vm1 = vcmask 130048   ;;  %v100_v11 = vstv %s337_s4 }
  0x14   :  { %195 = vmatprep.subr.bf16.mxu0 %v264_v0  ;;  %197 = vmatprep.mubr.msk.bf16.mxu0 %vm265_vm0, %v264_v0  ;;  %v37_v2 = vld [vmem:[%s333_s0] sm:$0x1]  ;;  %s266_s13 = smov [#allocation6]   ;;  %vm171_vm2 = vcmask 8192  }
  0x15   :  { %201 = vmatprep.subr.mxu1 %v264_v0  ;;  %203 = vmatprep.mubr.msk.f32.mxu1 %vm265_vm0, %v264_v0  ;;  %v188_v3 = vld [vmem:[%s335_s2] ss:$0 sm:$0xff]  ;;  %s179_s14 = sshll.u32 %s266_s13, 4  ;;  %s180_s14 = int_to_ptr.vmem [resolvable:$true] %s179_s14 }
  0x16   :  { %196 = vmatpush3.bf16.msra.mxu0 %v212_v1  ;;  %v98_v10 = vld [vmem:[%s336_s3] sm:$0x1]  ;;  %s235_s2 = scalar_lea.vmem %s180_s14, 16  ;;  %s239_s15 = scalar_lea.vmem %s180_s14, 32 }
  0x17   :  { %p236_p8 = scmp.ne.s32.totalorder %s180_s14, %s235_s2  ;;  %p240_p9 = scmp.lt.s32.totalorder %s180_s14, %s180_s14 }
  0x18   :  { %p241_p10 = scmp.lt.s32.totalorder %s239_s15, %s235_s2 }
  0x19   :  { %198 = vmatmul.mubr.msk.bf16.vlgmr.msra.gmra.mrb[0].mxu0 %vm53_vm1, %v37_v2 }
  0x1a   :  { %p242_p11 = por %p241_p10, %p240_p9 }
  0x1c   :  { %p243_p12 = pnand %p242_p11, %p236_p8 }
  0xec   :  { %v91_v4 = vpop.f32.mrb[0].mxu0 }
  0xed   :  { %v92_v5 = vadd.f32 %v188_v3, %v91_v4  ;;  %v199_v6 = vpop.f32.mrb[1].mxu0 }
  0xee   :  { %v94_v7 = vpop.f32.mrb[2].mxu0 }
  0xef   :  { %v97_v8 = vmax.f32 %v92_v5, 0.0  ;;  %v200_v9 = vpop.f32.mrb[3].mxu0 }
  0xf1   :  { %202 = vmatpush3.xpose.msra.mxu1 %v97_v8 }
  0xf4   :  { %204 = vmatmul.mubr.f32.vlgmr.msra.gmra.mrb[0].mxu1 %v98_v10 }
 0x1c7   :  { %v167_v12 = vpop.f32.mrb[0].mxu1 }
 0x1c8   :  { %v168_v13 = vadd.f32 %v167_v12, %v100_v11  ;;  %v205_v14 = vpop.f32.mrb[1].mxu1 }
 0x1ca   :  { %172 = vst.msk [vmem:[#allocation6] sm:$0x1] %vm171_vm2, %v168_v13 }
 0x1cb   :  { %246 = shalt.err (!%p243_p12)
}
 0x1cc   :  { %s247_s4 = scalar_lea.hbm %s338_s5, 16 }
 0x1cd   :  { %p248_p13 = scmp.ne.s32.totalorder %s338_s5, %s247_s4  ;;  %p251_p0 = scmp.lt.u32.totalorder %s247_s4, %s338_s5 }
 0x1cf   :  { %p253_p1 = pnand %p251_p0, %p248_p13 }
 0x1d1   :  { %256 = shalt.err (!%p253_p1)
}
 0x1d2   :  { %182 = dma.vmem_to_hbm [thread:$0]  %s180_s14, 16, %s338_s5, [#allocation5]  }
 0x1d3   :  { %259 = dma.done.wait [#allocation5], 16  }
 0x1d4   :  { %260 = vsyncadd [#allocation5], 4294967280 }
 0x1d5   :  { %186 = vsyncpa [#allocation4], 1 }
 0x1d6   :  { %187 = vsyncpa [#allocation5], 1 }

</bundles_post_ra>
